<compile_context>
chip_gen: v6e
topology: v6e:2x2x1
jax: 0.10.0
libtpu: 0.0.40
codegen_flags: <defaults>
</compile_context>

<pallas_src>
import functools

import jax
import jax.numpy as jnp
from jax.experimental import pallas as pl
from jax.experimental.pallas import tpu as pltpu

IN_F, H1, H2, OUT_F = 8, 6, 4, 1


def _dense_sigmoid_rows(h_rows, w_ref, b_ref, in_f, out_f):
    """out_rows[j] = sigmoid(b[j] + sum_k w[k, j] * h_rows[k]).

    h_rows is a Python list of (1, TILE_B) lane-dense rows (batch on lanes).
    w_ref/b_ref are SMEM refs; weights/biases are read as scalars, so each term
    is a scalar*vector FMA on the VPU and the bias is folded into the
    accumulator start (no broadcast materialization per grid step).
    """
    out_rows = []
    for j in range(out_f):
        acc = h_rows[0] * w_ref[0, j] + b_ref[j]
        for k in range(1, in_f):
            acc = acc + h_rows[k] * w_ref[k, j]
        out_rows.append(jax.nn.sigmoid(acc))
    return out_rows


def mlp_kernel(w1_ref, b1_ref, w2_ref, b2_ref, w3_ref, b3_ref, x_ref, out_ref):
    # x_ref block: (8, TILE_B) — features on sublanes, batch on lanes.
    x = x_ref[...]
    h0 = [x[k:k + 1, :] for k in range(IN_F)]              # 8 rows of (1, TILE_B)
    h1 = _dense_sigmoid_rows(h0, w1_ref, b1_ref, IN_F, H1)  # 6 rows
    h2 = _dense_sigmoid_rows(h1, w2_ref, b2_ref, H1, H2)    # 4 rows
    h3 = _dense_sigmoid_rows(h2, w3_ref, b3_ref, H2, OUT_F)  # 1 row
    out_ref[...] = h3[0].astype(out_ref.dtype)               # lane-dense (1, TILE_B) store


def _round_up(n, m):
    return ((n + m - 1) // m) * m


@functools.partial(jax.jit, static_argnames=("tile_b",))
def mlp_forward(x, w1, b1, w2, b2, w3, b3, tile_b=1024):
    """x: (batch, 8); weights stored as (in, out); biases as (out,)."""
    batch = x.shape[0]
    tb = min(tile_b, _round_up(batch, 128))      # lane-aligned tile, capped for small batch
    padded = _round_up(batch, tb)
    num_tiles = padded // tb

    # Put batch on the lane axis, zero-pad to the tile grid.
    xt = jnp.pad(x.T, ((0, 0), (0, padded - batch)))

    smem = pl.BlockSpec(memory_space=pltpu.MemorySpace.SMEM)
    out = pl.pallas_call(
        mlp_kernel,
        grid=(num_tiles,),
        in_specs=[smem, smem, smem, smem, smem, smem,
                  pl.BlockSpec((IN_F, tb), lambda i: (0, i))],
        out_specs=pl.BlockSpec((OUT_F, tb), lambda i: (0, i)),
        out_shape=jax.ShapeDtypeStruct((OUT_F, padded), x.dtype),
        compiler_params=pltpu.CompilerParams(
            dimension_semantics=("parallel",)),   # shard batch tiles across TCs (v7x)
    )(w1, b1, w2, b2, w3, b3, xt)

    # Back to the PyTorch layout: (batch, 1).
    return out[0, :batch].reshape(batch, 1)


def init_linear(key, in_f, out_f, dtype=jnp.float32):
    # PyTorch nn.Linear default init: U(-1/sqrt(in_f), 1/sqrt(in_f))
    kw, kb = jax.random.split(key)
    bound = 1.0 / (in_f ** 0.5)
    w = jax.random.uniform(kw, (in_f, out_f), dtype, minval=-bound, maxval=bound)
    b = jax.random.uniform(kb, (out_f,), dtype, minval=-bound, maxval=bound)
    return w, b


if __name__ == "__main__":
    key = jax.random.PRNGKey(0)
    kx, k1, k2, k3 = jax.random.split(key, 4)

    batch = 8
    x = jax.random.normal(kx, (batch, IN_F), dtype=jnp.float32)

    w1, b1 = init_linear(k1, IN_F, H1)
    w2, b2 = init_linear(k2, H1, H2)
    w3, b3 = init_linear(k3, H2, OUT_F)

    y = mlp_forward(x, w1, b1, w2, b2, w3, b3)
    y = jax.block_until_ready(y)

    # Reference check in plain JAX
    a1 = jax.nn.sigmoid(x @ w1 + b1)
    a2 = jax.nn.sigmoid(a1 @ w2 + b2)
    y_ref = jax.nn.sigmoid(a2 @ w3 + b3)

    assert y.shape == (batch, 1)
    assert jnp.allclose(y, y_ref, atol=1e-5, rtol=1e-5), float(jnp.max(jnp.abs(y - y_ref)))

    print("KERNEL_OK")
</pallas_src>

<mosaic_0001>
module attributes {stable_mosaic.version = 11 : i64} {
  func.func @mlp_kernel(%arg0: i32, %arg1: memref<8x6xf32, #tpu.memory_space<smem>>, %arg2: memref<6xf32, #tpu.memory_space<smem>>, %arg3: memref<6x4xf32, #tpu.memory_space<smem>>, %arg4: memref<4xf32, #tpu.memory_space<smem>>, %arg5: memref<4x1xf32, #tpu.memory_space<smem>>, %arg6: memref<1xf32, #tpu.memory_space<smem>>, %arg7: memref<8x128xf32, #tpu.memory_space<vmem>>, %arg8: memref<1x128xf32, #tpu.memory_space<vmem>>) attributes {dimension_semantics = [#tpu.dimension_semantics<parallel>], iteration_bounds = array<i64: 1>, scalar_prefetch = 0 : i64, scratch_operands = 0 : i64, tpu.core_type = #tpu.core_type<tc>, window_params = [{transform_indices = @transform_0, window_bounds = array<i64: 8, 6>}, {transform_indices = @transform_1, window_bounds = array<i64: 6>}, {transform_indices = @transform_2, window_bounds = array<i64: 6, 4>}, {transform_indices = @transform_3, window_bounds = array<i64: 4>}, {transform_indices = @transform_4, window_bounds = array<i64: 4, 1>}, {transform_indices = @transform_5, window_bounds = array<i64: 1>}, {transform_indices = @transform_6, window_bounds = array<i64: 8, 128>}, {transform_indices = @transform_7, window_bounds = array<i64: 1, 128>}]} {
    %c0 = arith.constant 0 : index
    %c0_0 = arith.constant 0 : index
    %0 = vector.load %arg7[%c0, %c0_0] : memref<8x128xf32, #tpu.memory_space<vmem>>, vector<8x128xf32>
    %1 = vector.extract_strided_slice %0 {offsets = [0, 0], sizes = [1, 128], strides = [1, 1]} : vector<8x128xf32> to vector<1x128xf32>
    %2 = vector.extract_strided_slice %0 {offsets = [1, 0], sizes = [1, 128], strides = [1, 1]} : vector<8x128xf32> to vector<1x128xf32>
    %3 = vector.extract_strided_slice %0 {offsets = [2, 0], sizes = [1, 128], strides = [1, 1]} : vector<8x128xf32> to vector<1x128xf32>
    %4 = vector.extract_strided_slice %0 {offsets = [3, 0], sizes = [1, 128], strides = [1, 1]} : vector<8x128xf32> to vector<1x128xf32>
    %5 = vector.extract_strided_slice %0 {offsets = [4, 0], sizes = [1, 128], strides = [1, 1]} : vector<8x128xf32> to vector<1x128xf32>
    %6 = vector.extract_strided_slice %0 {offsets = [5, 0], sizes = [1, 128], strides = [1, 1]} : vector<8x128xf32> to vector<1x128xf32>
    %7 = vector.extract_strided_slice %0 {offsets = [6, 0], sizes = [1, 128], strides = [1, 1]} : vector<8x128xf32> to vector<1x128xf32>
    %8 = vector.extract_strided_slice %0 {offsets = [7, 0], sizes = [1, 128], strides = [1, 1]} : vector<8x128xf32> to vector<1x128xf32>
    %c0_1 = arith.constant 0 : index
    %c0_2 = arith.constant 0 : index
    %9 = memref.load %arg1[%c0_1, %c0_2] : memref<8x6xf32, #tpu.memory_space<smem>>
    %10 = vector.broadcast %9 : f32 to vector<1x128xf32>
    %11 = arith.mulf %1, %10 : vector<1x128xf32>
    %c0_3 = arith.constant 0 : index
    %12 = memref.load %arg2[%c0_3] : memref<6xf32, #tpu.memory_space<smem>>
    %13 = vector.broadcast %12 : f32 to vector<1x128xf32>
    %14 = arith.addf %11, %13 : vector<1x128xf32>
    %c1 = arith.constant 1 : index
    %c0_4 = arith.constant 0 : index
    %15 = memref.load %arg1[%c1, %c0_4] : memref<8x6xf32, #tpu.memory_space<smem>>
    %16 = vector.broadcast %15 : f32 to vector<1x128xf32>
    %17 = arith.mulf %2, %16 : vector<1x128xf32>
    %18 = arith.addf %14, %17 : vector<1x128xf32>
    %c2 = arith.constant 2 : index
    %c0_5 = arith.constant 0 : index
    %19 = memref.load %arg1[%c2, %c0_5] : memref<8x6xf32, #tpu.memory_space<smem>>
    %20 = vector.broadcast %19 : f32 to vector<1x128xf32>
    %21 = arith.mulf %3, %20 : vector<1x128xf32>
    %22 = arith.addf %18, %21 : vector<1x128xf32>
    %c3 = arith.constant 3 : index
    %c0_6 = arith.constant 0 : index
    %23 = memref.load %arg1[%c3, %c0_6] : memref<8x6xf32, #tpu.memory_space<smem>>
    %24 = vector.broadcast %23 : f32 to vector<1x128xf32>
    %25 = arith.mulf %4, %24 : vector<1x128xf32>
    %26 = arith.addf %22, %25 : vector<1x128xf32>
    %c4 = arith.constant 4 : index
    %c0_7 = arith.constant 0 : index
    %27 = memref.load %arg1[%c4, %c0_7] : memref<8x6xf32, #tpu.memory_space<smem>>
    %28 = vector.broadcast %27 : f32 to vector<1x128xf32>
    %29 = arith.mulf %5, %28 : vector<1x128xf32>
    %30 = arith.addf %26, %29 : vector<1x128xf32>
    %c5 = arith.constant 5 : index
    %c0_8 = arith.constant 0 : index
    %31 = memref.load %arg1[%c5, %c0_8] : memref<8x6xf32, #tpu.memory_space<smem>>
    %32 = vector.broadcast %31 : f32 to vector<1x128xf32>
    %33 = arith.mulf %6, %32 : vector<1x128xf32>
    %34 = arith.addf %30, %33 : vector<1x128xf32>
    %c6 = arith.constant 6 : index
    %c0_9 = arith.constant 0 : index
    %35 = memref.load %arg1[%c6, %c0_9] : memref<8x6xf32, #tpu.memory_space<smem>>
    %36 = vector.broadcast %35 : f32 to vector<1x128xf32>
    %37 = arith.mulf %7, %36 : vector<1x128xf32>
    %38 = arith.addf %34, %37 : vector<1x128xf32>
    %c7 = arith.constant 7 : index
    %c0_10 = arith.constant 0 : index
    %39 = memref.load %arg1[%c7, %c0_10] : memref<8x6xf32, #tpu.memory_space<smem>>
    %40 = vector.broadcast %39 : f32 to vector<1x128xf32>
    %41 = arith.mulf %8, %40 : vector<1x128xf32>
    %42 = arith.addf %38, %41 : vector<1x128xf32>
    %43 = arith.negf %42 : vector<1x128xf32>
    %44 = math.exp %43 : vector<1x128xf32>
    %cst = arith.constant 1.000000e+00 : f32
    %45 = vector.broadcast %cst : f32 to vector<1x128xf32>
    %46 = arith.addf %45, %44 : vector<1x128xf32>
    %47 = arith.divf %45, %46 : vector<1x128xf32>
    %c0_11 = arith.constant 0 : index
    %c1_12 = arith.constant 1 : index
    %48 = memref.load %arg1[%c0_11, %c1_12] : memref<8x6xf32, #tpu.memory_space<smem>>
    %49 = vector.broadcast %48 : f32 to vector<1x128xf32>
    %50 = arith.mulf %1, %49 : vector<1x128xf32>
    %c1_13 = arith.constant 1 : index
    %51 = memref.load %arg2[%c1_13] : memref<6xf32, #tpu.memory_space<smem>>
    %52 = vector.broadcast %51 : f32 to vector<1x128xf32>
    %53 = arith.addf %50, %52 : vector<1x128xf32>
    %c1_14 = arith.constant 1 : index
    %c1_15 = arith.constant 1 : index
    %54 = memref.load %arg1[%c1_14, %c1_15] : memref<8x6xf32, #tpu.memory_space<smem>>
    %55 = vector.broadcast %54 : f32 to vector<1x128xf32>
    %56 = arith.mulf %2, %55 : vector<1x128xf32>
    %57 = arith.addf %53, %56 : vector<1x128xf32>
    %c2_16 = arith.constant 2 : index
    %c1_17 = arith.constant 1 : index
    %58 = memref.load %arg1[%c2_16, %c1_17] : memref<8x6xf32, #tpu.memory_space<smem>>
    %59 = vector.broadcast %58 : f32 to vector<1x128xf32>
    %60 = arith.mulf %3, %59 : vector<1x128xf32>
    %61 = arith.addf %57, %60 : vector<1x128xf32>
    %c3_18 = arith.constant 3 : index
    %c1_19 = arith.constant 1 : index
    %62 = memref.load %arg1[%c3_18, %c1_19] : memref<8x6xf32, #tpu.memory_space<smem>>
    %63 = vector.broadcast %62 : f32 to vector<1x128xf32>
    %64 = arith.mulf %4, %63 : vector<1x128xf32>
    %65 = arith.addf %61, %64 : vector<1x128xf32>
    %c4_20 = arith.constant 4 : index
    %c1_21 = arith.constant 1 : index
    %66 = memref.load %arg1[%c4_20, %c1_21] : memref<8x6xf32, #tpu.memory_space<smem>>
    %67 = vector.broadcast %66 : f32 to vector<1x128xf32>
    %68 = arith.mulf %5, %67 : vector<1x128xf32>
    %69 = arith.addf %65, %68 : vector<1x128xf32>
    %c5_22 = arith.constant 5 : index
    %c1_23 = arith.constant 1 : index
    %70 = memref.load %arg1[%c5_22, %c1_23] : memref<8x6xf32, #tpu.memory_space<smem>>
    %71 = vector.broadcast %70 : f32 to vector<1x128xf32>
    %72 = arith.mulf %6, %71 : vector<1x128xf32>
    %73 = arith.addf %69, %72 : vector<1x128xf32>
    %c6_24 = arith.constant 6 : index
    %c1_25 = arith.constant 1 : index
    %74 = memref.load %arg1[%c6_24, %c1_25] : memref<8x6xf32, #tpu.memory_space<smem>>
    %75 = vector.broadcast %74 : f32 to vector<1x128xf32>
    %76 = arith.mulf %7, %75 : vector<1x128xf32>
    %77 = arith.addf %73, %76 : vector<1x128xf32>
    %c7_26 = arith.constant 7 : index
    %c1_27 = arith.constant 1 : index
    %78 = memref.load %arg1[%c7_26, %c1_27] : memref<8x6xf32, #tpu.memory_space<smem>>
    %79 = vector.broadcast %78 : f32 to vector<1x128xf32>
    %80 = arith.mulf %8, %79 : vector<1x128xf32>
    %81 = arith.addf %77, %80 : vector<1x128xf32>
    %82 = arith.negf %81 : vector<1x128xf32>
    %83 = math.exp %82 : vector<1x128xf32>
    %cst_28 = arith.constant 1.000000e+00 : f32
    %84 = vector.broadcast %cst_28 : f32 to vector<1x128xf32>
    %85 = arith.addf %84, %83 : vector<1x128xf32>
    %86 = arith.divf %84, %85 : vector<1x128xf32>
    %c0_29 = arith.constant 0 : index
    %c2_30 = arith.constant 2 : index
    %87 = memref.load %arg1[%c0_29, %c2_30] : memref<8x6xf32, #tpu.memory_space<smem>>
    %88 = vector.broadcast %87 : f32 to vector<1x128xf32>
    %89 = arith.mulf %1, %88 : vector<1x128xf32>
    %c2_31 = arith.constant 2 : index
    %90 = memref.load %arg2[%c2_31] : memref<6xf32, #tpu.memory_space<smem>>
    %91 = vector.broadcast %90 : f32 to vector<1x128xf32>
    %92 = arith.addf %89, %91 : vector<1x128xf32>
    %c1_32 = arith.constant 1 : index
    %c2_33 = arith.constant 2 : index
    %93 = memref.load %arg1[%c1_32, %c2_33] : memref<8x6xf32, #tpu.memory_space<smem>>
    %94 = vector.broadcast %93 : f32 to vector<1x128xf32>
    %95 = arith.mulf %2, %94 : vector<1x128xf32>
    %96 = arith.addf %92, %95 : vector<1x128xf32>
    %c2_34 = arith.constant 2 : index
    %c2_35 = arith.constant 2 : index
    %97 = memref.load %arg1[%c2_34, %c2_35] : memref<8x6xf32, #tpu.memory_space<smem>>
    %98 = vector.broadcast %97 : f32 to vector<1x128xf32>
    %99 = arith.mulf %3, %98 : vector<1x128xf32>
    %100 = arith.addf %96, %99 : vector<1x128xf32>
    %c3_36 = arith.constant 3 : index
    %c2_37 = arith.constant 2 : index
    %101 = memref.load %arg1[%c3_36, %c2_37] : memref<8x6xf32, #tpu.memory_space<smem>>
    %102 = vector.broadcast %101 : f32 to vector<1x128xf32>
    %103 = arith.mulf %4, %102 : vector<1x128xf32>
    %104 = arith.addf %100, %103 : vector<1x128xf32>
    %c4_38 = arith.constant 4 : index
    %c2_39 = arith.constant 2 : index
    %105 = memref.load %arg1[%c4_38, %c2_39] : memref<8x6xf32, #tpu.memory_space<smem>>
    %106 = vector.broadcast %105 : f32 to vector<1x128xf32>
    %107 = arith.mulf %5, %106 : vector<1x128xf32>
    %108 = arith.addf %104, %107 : vector<1x128xf32>
    %c5_40 = arith.constant 5 : index
    %c2_41 = arith.constant 2 : index
    %109 = memref.load %arg1[%c5_40, %c2_41] : memref<8x6xf32, #tpu.memory_space<smem>>
    %110 = vector.broadcast %109 : f32 to vector<1x128xf32>
    %111 = arith.mulf %6, %110 : vector<1x128xf32>
    %112 = arith.addf %108, %111 : vector<1x128xf32>
    %c6_42 = arith.constant 6 : index
    %c2_43 = arith.constant 2 : index
    %113 = memref.load %arg1[%c6_42, %c2_43] : memref<8x6xf32, #tpu.memory_space<smem>>
    %114 = vector.broadcast %113 : f32 to vector<1x128xf32>
    %115 = arith.mulf %7, %114 : vector<1x128xf32>
    %116 = arith.addf %112, %115 : vector<1x128xf32>
    %c7_44 = arith.constant 7 : index
    %c2_45 = arith.constant 2 : index
    %117 = memref.load %arg1[%c7_44, %c2_45] : memref<8x6xf32, #tpu.memory_space<smem>>
    %118 = vector.broadcast %117 : f32 to vector<1x128xf32>
    %119 = arith.mulf %8, %118 : vector<1x128xf32>
    %120 = arith.addf %116, %119 : vector<1x128xf32>
    %121 = arith.negf %120 : vector<1x128xf32>
    %122 = math.exp %121 : vector<1x128xf32>
    %cst_46 = arith.constant 1.000000e+00 : f32
    %123 = vector.broadcast %cst_46 : f32 to vector<1x128xf32>
    %124 = arith.addf %123, %122 : vector<1x128xf32>
    %125 = arith.divf %123, %124 : vector<1x128xf32>
    %c0_47 = arith.constant 0 : index
    %c3_48 = arith.constant 3 : index
    %126 = memref.load %arg1[%c0_47, %c3_48] : memref<8x6xf32, #tpu.memory_space<smem>>
    %127 = vector.broadcast %126 : f32 to vector<1x128xf32>
    %128 = arith.mulf %1, %127 : vector<1x128xf32>
    %c3_49 = arith.constant 3 : index
    %129 = memref.load %arg2[%c3_49] : memref<6xf32, #tpu.memory_space<smem>>
    %130 = vector.broadcast %129 : f32 to vector<1x128xf32>
    %131 = arith.addf %128, %130 : vector<1x128xf32>
    %c1_50 = arith.constant 1 : index
    %c3_51 = arith.constant 3 : index
    %132 = memref.load %arg1[%c1_50, %c3_51] : memref<8x6xf32, #tpu.memory_space<smem>>
    %133 = vector.broadcast %132 : f32 to vector<1x128xf32>
    %134 = arith.mulf %2, %133 : vector<1x128xf32>
    %135 = arith.addf %131, %134 : vector<1x128xf32>
    %c2_52 = arith.constant 2 : index
    %c3_53 = arith.constant 3 : index
    %136 = memref.load %arg1[%c2_52, %c3_53] : memref<8x6xf32, #tpu.memory_space<smem>>
    %137 = vector.broadcast %136 : f32 to vector<1x128xf32>
    %138 = arith.mulf %3, %137 : vector<1x128xf32>
    %139 = arith.addf %135, %138 : vector<1x128xf32>
    %c3_54 = arith.constant 3 : index
    %c3_55 = arith.constant 3 : index
    %140 = memref.load %arg1[%c3_54, %c3_55] : memref<8x6xf32, #tpu.memory_space<smem>>
    %141 = vector.broadcast %140 : f32 to vector<1x128xf32>
    %142 = arith.mulf %4, %141 : vector<1x128xf32>
    %143 = arith.addf %139, %142 : vector<1x128xf32>
    %c4_56 = arith.constant 4 : index
    %c3_57 = arith.constant 3 : index
    %144 = memref.load %arg1[%c4_56, %c3_57] : memref<8x6xf32, #tpu.memory_space<smem>>
    %145 = vector.broadcast %144 : f32 to vector<1x128xf32>
    %146 = arith.mulf %5, %145 : vector<1x128xf32>
    %147 = arith.addf %143, %146 : vector<1x128xf32>
    %c5_58 = arith.constant 5 : index
    %c3_59 = arith.constant 3 : index
    %148 = memref.load %arg1[%c5_58, %c3_59] : memref<8x6xf32, #tpu.memory_space<smem>>
    %149 = vector.broadcast %148 : f32 to vector<1x128xf32>
    %150 = arith.mulf %6, %149 : vector<1x128xf32>
    %151 = arith.addf %147, %150 : vector<1x128xf32>
    %c6_60 = arith.constant 6 : index
    %c3_61 = arith.constant 3 : index
    %152 = memref.load %arg1[%c6_60, %c3_61] : memref<8x6xf32, #tpu.memory_space<smem>>
    %153 = vector.broadcast %152 : f32 to vector<1x128xf32>
    %154 = arith.mulf %7, %153 : vector<1x128xf32>
    %155 = arith.addf %151, %154 : vector<1x128xf32>
    %c7_62 = arith.constant 7 : index
    %c3_63 = arith.constant 3 : index
    %156 = memref.load %arg1[%c7_62, %c3_63] : memref<8x6xf32, #tpu.memory_space<smem>>
    %157 = vector.broadcast %156 : f32 to vector<1x128xf32>
    %158 = arith.mulf %8, %157 : vector<1x128xf32>
    %159 = arith.addf %155, %158 : vector<1x128xf32>
    %160 = arith.negf %159 : vector<1x128xf32>
    %161 = math.exp %160 : vector<1x128xf32>
    %cst_64 = arith.constant 1.000000e+00 : f32
    %162 = vector.broadcast %cst_64 : f32 to vector<1x128xf32>
    %163 = arith.addf %162, %161 : vector<1x128xf32>
    %164 = arith.divf %162, %163 : vector<1x128xf32>
    %c0_65 = arith.constant 0 : index
    %c4_66 = arith.constant 4 : index
    %165 = memref.load %arg1[%c0_65, %c4_66] : memref<8x6xf32, #tpu.memory_space<smem>>
    %166 = vector.broadcast %165 : f32 to vector<1x128xf32>
    %167 = arith.mulf %1, %166 : vector<1x128xf32>
    %c4_67 = arith.constant 4 : index
    %168 = memref.load %arg2[%c4_67] : memref<6xf32, #tpu.memory_space<smem>>
    %169 = vector.broadcast %168 : f32 to vector<1x128xf32>
    %170 = arith.addf %167, %169 : vector<1x128xf32>
    %c1_68 = arith.constant 1 : index
    %c4_69 = arith.constant 4 : index
    %171 = memref.load %arg1[%c1_68, %c4_69] : memref<8x6xf32, #tpu.memory_space<smem>>
    %172 = vector.broadcast %171 : f32 to vector<1x128xf32>
    %173 = arith.mulf %2, %172 : vector<1x128xf32>
    %174 = arith.addf %170, %173 : vector<1x128xf32>
    %c2_70 = arith.constant 2 : index
    %c4_71 = arith.constant 4 : index
    %175 = memref.load %arg1[%c2_70, %c4_71] : memref<8x6xf32, #tpu.memory_space<smem>>
    %176 = vector.broadcast %175 : f32 to vector<1x128xf32>
    %177 = arith.mulf %3, %176 : vector<1x128xf32>
    %178 = arith.addf %174, %177 : vector<1x128xf32>
    %c3_72 = arith.constant 3 : index
    %c4_73 = arith.constant 4 : index
    %179 = memref.load %arg1[%c3_72, %c4_73] : memref<8x6xf32, #tpu.memory_space<smem>>
    %180 = vector.broadcast %179 : f32 to vector<1x128xf32>
    %181 = arith.mulf %4, %180 : vector<1x128xf32>
    %182 = arith.addf %178, %181 : vector<1x128xf32>
    %c4_74 = arith.constant 4 : index
    %c4_75 = arith.constant 4 : index
    %183 = memref.load %arg1[%c4_74, %c4_75] : memref<8x6xf32, #tpu.memory_space<smem>>
    %184 = vector.broadcast %183 : f32 to vector<1x128xf32>
    %185 = arith.mulf %5, %184 : vector<1x128xf32>
    %186 = arith.addf %182, %185 : vector<1x128xf32>
    %c5_76 = arith.constant 5 : index
    %c4_77 = arith.constant 4 : index
    %187 = memref.load %arg1[%c5_76, %c4_77] : memref<8x6xf32, #tpu.memory_space<smem>>
    %188 = vector.broadcast %187 : f32 to vector<1x128xf32>
    %189 = arith.mulf %6, %188 : vector<1x128xf32>
    %190 = arith.addf %186, %189 : vector<1x128xf32>
    %c6_78 = arith.constant 6 : index
    %c4_79 = arith.constant 4 : index
    %191 = memref.load %arg1[%c6_78, %c4_79] : memref<8x6xf32, #tpu.memory_space<smem>>
    %192 = vector.broadcast %191 : f32 to vector<1x128xf32>
    %193 = arith.mulf %7, %192 : vector<1x128xf32>
    %194 = arith.addf %190, %193 : vector<1x128xf32>
    %c7_80 = arith.constant 7 : index
    %c4_81 = arith.constant 4 : index
    %195 = memref.load %arg1[%c7_80, %c4_81] : memref<8x6xf32, #tpu.memory_space<smem>>
    %196 = vector.broadcast %195 : f32 to vector<1x128xf32>
    %197 = arith.mulf %8, %196 : vector<1x128xf32>
    %198 = arith.addf %194, %197 : vector<1x128xf32>
    %199 = arith.negf %198 : vector<1x128xf32>
    %200 = math.exp %199 : vector<1x128xf32>
    %cst_82 = arith.constant 1.000000e+00 : f32
    %201 = vector.broadcast %cst_82 : f32 to vector<1x128xf32>
    %202 = arith.addf %201, %200 : vector<1x128xf32>
    %203 = arith.divf %201, %202 : vector<1x128xf32>
    %c0_83 = arith.constant 0 : index
    %c5_84 = arith.constant 5 : index
    %204 = memref.load %arg1[%c0_83, %c5_84] : memref<8x6xf32, #tpu.memory_space<smem>>
    %205 = vector.broadcast %204 : f32 to vector<1x128xf32>
    %206 = arith.mulf %1, %205 : vector<1x128xf32>
    %c5_85 = arith.constant 5 : index
    %207 = memref.load %arg2[%c5_85] : memref<6xf32, #tpu.memory_space<smem>>
    %208 = vector.broadcast %207 : f32 to vector<1x128xf32>
    %209 = arith.addf %206, %208 : vector<1x128xf32>
    %c1_86 = arith.constant 1 : index
    %c5_87 = arith.constant 5 : index
    %210 = memref.load %arg1[%c1_86, %c5_87] : memref<8x6xf32, #tpu.memory_space<smem>>
    %211 = vector.broadcast %210 : f32 to vector<1x128xf32>
    %212 = arith.mulf %2, %211 : vector<1x128xf32>
    %213 = arith.addf %209, %212 : vector<1x128xf32>
    %c2_88 = arith.constant 2 : index
    %c5_89 = arith.constant 5 : index
    %214 = memref.load %arg1[%c2_88, %c5_89] : memref<8x6xf32, #tpu.memory_space<smem>>
    %215 = vector.broadcast %214 : f32 to vector<1x128xf32>
    %216 = arith.mulf %3, %215 : vector<1x128xf32>
    %217 = arith.addf %213, %216 : vector<1x128xf32>
    %c3_90 = arith.constant 3 : index
    %c5_91 = arith.constant 5 : index
    %218 = memref.load %arg1[%c3_90, %c5_91] : memref<8x6xf32, #tpu.memory_space<smem>>
    %219 = vector.broadcast %218 : f32 to vector<1x128xf32>
    %220 = arith.mulf %4, %219 : vector<1x128xf32>
    %221 = arith.addf %217, %220 : vector<1x128xf32>
    %c4_92 = arith.constant 4 : index
    %c5_93 = arith.constant 5 : index
    %222 = memref.load %arg1[%c4_92, %c5_93] : memref<8x6xf32, #tpu.memory_space<smem>>
    %223 = vector.broadcast %222 : f32 to vector<1x128xf32>
    %224 = arith.mulf %5, %223 : vector<1x128xf32>
    %225 = arith.addf %221, %224 : vector<1x128xf32>
    %c5_94 = arith.constant 5 : index
    %c5_95 = arith.constant 5 : index
    %226 = memref.load %arg1[%c5_94, %c5_95] : memref<8x6xf32, #tpu.memory_space<smem>>
    %227 = vector.broadcast %226 : f32 to vector<1x128xf32>
    %228 = arith.mulf %6, %227 : vector<1x128xf32>
    %229 = arith.addf %225, %228 : vector<1x128xf32>
    %c6_96 = arith.constant 6 : index
    %c5_97 = arith.constant 5 : index
    %230 = memref.load %arg1[%c6_96, %c5_97] : memref<8x6xf32, #tpu.memory_space<smem>>
    %231 = vector.broadcast %230 : f32 to vector<1x128xf32>
    %232 = arith.mulf %7, %231 : vector<1x128xf32>
    %233 = arith.addf %229, %232 : vector<1x128xf32>
    %c7_98 = arith.constant 7 : index
    %c5_99 = arith.constant 5 : index
    %234 = memref.load %arg1[%c7_98, %c5_99] : memref<8x6xf32, #tpu.memory_space<smem>>
    %235 = vector.broadcast %234 : f32 to vector<1x128xf32>
    %236 = arith.mulf %8, %235 : vector<1x128xf32>
    %237 = arith.addf %233, %236 : vector<1x128xf32>
    %238 = arith.negf %237 : vector<1x128xf32>
    %239 = math.exp %238 : vector<1x128xf32>
    %cst_100 = arith.constant 1.000000e+00 : f32
    %240 = vector.broadcast %cst_100 : f32 to vector<1x128xf32>
    %241 = arith.addf %240, %239 : vector<1x128xf32>
    %242 = arith.divf %240, %241 : vector<1x128xf32>
    %c0_101 = arith.constant 0 : index
    %c0_102 = arith.constant 0 : index
    %243 = memref.load %arg3[%c0_101, %c0_102] : memref<6x4xf32, #tpu.memory_space<smem>>
    %244 = vector.broadcast %243 : f32 to vector<1x128xf32>
    %245 = arith.mulf %47, %244 : vector<1x128xf32>
    %c0_103 = arith.constant 0 : index
    %246 = memref.load %arg4[%c0_103] : memref<4xf32, #tpu.memory_space<smem>>
    %247 = vector.broadcast %246 : f32 to vector<1x128xf32>
    %248 = arith.addf %245, %247 : vector<1x128xf32>
    %c1_104 = arith.constant 1 : index
    %c0_105 = arith.constant 0 : index
    %249 = memref.load %arg3[%c1_104, %c0_105] : memref<6x4xf32, #tpu.memory_space<smem>>
    %250 = vector.broadcast %249 : f32 to vector<1x128xf32>
    %251 = arith.mulf %86, %250 : vector<1x128xf32>
    %252 = arith.addf %248, %251 : vector<1x128xf32>
    %c2_106 = arith.constant 2 : index
    %c0_107 = arith.constant 0 : index
    %253 = memref.load %arg3[%c2_106, %c0_107] : memref<6x4xf32, #tpu.memory_space<smem>>
    %254 = vector.broadcast %253 : f32 to vector<1x128xf32>
    %255 = arith.mulf %125, %254 : vector<1x128xf32>
    %256 = arith.addf %252, %255 : vector<1x128xf32>
    %c3_108 = arith.constant 3 : index
    %c0_109 = arith.constant 0 : index
    %257 = memref.load %arg3[%c3_108, %c0_109] : memref<6x4xf32, #tpu.memory_space<smem>>
    %258 = vector.broadcast %257 : f32 to vector<1x128xf32>
    %259 = arith.mulf %164, %258 : vector<1x128xf32>
    %260 = arith.addf %256, %259 : vector<1x128xf32>
    %c4_110 = arith.constant 4 : index
    %c0_111 = arith.constant 0 : index
    %261 = memref.load %arg3[%c4_110, %c0_111] : memref<6x4xf32, #tpu.memory_space<smem>>
    %262 = vector.broadcast %261 : f32 to vector<1x128xf32>
    %263 = arith.mulf %203, %262 : vector<1x128xf32>
    %264 = arith.addf %260, %263 : vector<1x128xf32>
    %c5_112 = arith.constant 5 : index
    %c0_113 = arith.constant 0 : index
    %265 = memref.load %arg3[%c5_112, %c0_113] : memref<6x4xf32, #tpu.memory_space<smem>>
    %266 = vector.broadcast %265 : f32 to vector<1x128xf32>
    %267 = arith.mulf %242, %266 : vector<1x128xf32>
    %268 = arith.addf %264, %267 : vector<1x128xf32>
    %269 = arith.negf %268 : vector<1x128xf32>
    %270 = math.exp %269 : vector<1x128xf32>
    %cst_114 = arith.constant 1.000000e+00 : f32
    %271 = vector.broadcast %cst_114 : f32 to vector<1x128xf32>
    %272 = arith.addf %271, %270 : vector<1x128xf32>
    %273 = arith.divf %271, %272 : vector<1x128xf32>
    %c0_115 = arith.constant 0 : index
    %c1_116 = arith.constant 1 : index
    %274 = memref.load %arg3[%c0_115, %c1_116] : memref<6x4xf32, #tpu.memory_space<smem>>
    %275 = vector.broadcast %274 : f32 to vector<1x128xf32>
    %276 = arith.mulf %47, %275 : vector<1x128xf32>
    %c1_117 = arith.constant 1 : index
    %277 = memref.load %arg4[%c1_117] : memref<4xf32, #tpu.memory_space<smem>>
    %278 = vector.broadcast %277 : f32 to vector<1x128xf32>
    %279 = arith.addf %276, %278 : vector<1x128xf32>
    %c1_118 = arith.constant 1 : index
    %c1_119 = arith.constant 1 : index
    %280 = memref.load %arg3[%c1_118, %c1_119] : memref<6x4xf32, #tpu.memory_space<smem>>
    %281 = vector.broadcast %280 : f32 to vector<1x128xf32>
    %282 = arith.mulf %86, %281 : vector<1x128xf32>
    %283 = arith.addf %279, %282 : vector<1x128xf32>
    %c2_120 = arith.constant 2 : index
    %c1_121 = arith.constant 1 : index
    %284 = memref.load %arg3[%c2_120, %c1_121] : memref<6x4xf32, #tpu.memory_space<smem>>
    %285 = vector.broadcast %284 : f32 to vector<1x128xf32>
    %286 = arith.mulf %125, %285 : vector<1x128xf32>
    %287 = arith.addf %283, %286 : vector<1x128xf32>
    %c3_122 = arith.constant 3 : index
    %c1_123 = arith.constant 1 : index
    %288 = memref.load %arg3[%c3_122, %c1_123] : memref<6x4xf32, #tpu.memory_space<smem>>
    %289 = vector.broadcast %288 : f32 to vector<1x128xf32>
    %290 = arith.mulf %164, %289 : vector<1x128xf32>
    %291 = arith.addf %287, %290 : vector<1x128xf32>
    %c4_124 = arith.constant 4 : index
    %c1_125 = arith.constant 1 : index
    %292 = memref.load %arg3[%c4_124, %c1_125] : memref<6x4xf32, #tpu.memory_space<smem>>
    %293 = vector.broadcast %292 : f32 to vector<1x128xf32>
    %294 = arith.mulf %203, %293 : vector<1x128xf32>
    %295 = arith.addf %291, %294 : vector<1x128xf32>
    %c5_126 = arith.constant 5 : index
    %c1_127 = arith.constant 1 : index
    %296 = memref.load %arg3[%c5_126, %c1_127] : memref<6x4xf32, #tpu.memory_space<smem>>
    %297 = vector.broadcast %296 : f32 to vector<1x128xf32>
    %298 = arith.mulf %242, %297 : vector<1x128xf32>
    %299 = arith.addf %295, %298 : vector<1x128xf32>
    %300 = arith.negf %299 : vector<1x128xf32>
    %301 = math.exp %300 : vector<1x128xf32>
    %cst_128 = arith.constant 1.000000e+00 : f32
    %302 = vector.broadcast %cst_128 : f32 to vector<1x128xf32>
    %303 = arith.addf %302, %301 : vector<1x128xf32>
    %304 = arith.divf %302, %303 : vector<1x128xf32>
    %c0_129 = arith.constant 0 : index
    %c2_130 = arith.constant 2 : index
    %305 = memref.load %arg3[%c0_129, %c2_130] : memref<6x4xf32, #tpu.memory_space<smem>>
    %306 = vector.broadcast %305 : f32 to vector<1x128xf32>
    %307 = arith.mulf %47, %306 : vector<1x128xf32>
    %c2_131 = arith.constant 2 : index
    %308 = memref.load %arg4[%c2_131] : memref<4xf32, #tpu.memory_space<smem>>
    %309 = vector.broadcast %308 : f32 to vector<1x128xf32>
    %310 = arith.addf %307, %309 : vector<1x128xf32>
    %c1_132 = arith.constant 1 : index
    %c2_133 = arith.constant 2 : index
    %311 = memref.load %arg3[%c1_132, %c2_133] : memref<6x4xf32, #tpu.memory_space<smem>>
    %312 = vector.broadcast %311 : f32 to vector<1x128xf32>
    %313 = arith.mulf %86, %312 : vector<1x128xf32>
    %314 = arith.addf %310, %313 : vector<1x128xf32>
    %c2_134 = arith.constant 2 : index
    %c2_135 = arith.constant 2 : index
    %315 = memref.load %arg3[%c2_134, %c2_135] : memref<6x4xf32, #tpu.memory_space<smem>>
    %316 = vector.broadcast %315 : f32 to vector<1x128xf32>
    %317 = arith.mulf %125, %316 : vector<1x128xf32>
    %318 = arith.addf %314, %317 : vector<1x128xf32>
    %c3_136 = arith.constant 3 : index
    %c2_137 = arith.constant 2 : index
    %319 = memref.load %arg3[%c3_136, %c2_137] : memref<6x4xf32, #tpu.memory_space<smem>>
    %320 = vector.broadcast %319 : f32 to vector<1x128xf32>
    %321 = arith.mulf %164, %320 : vector<1x128xf32>
    %322 = arith.addf %318, %321 : vector<1x128xf32>
    %c4_138 = arith.constant 4 : index
    %c2_139 = arith.constant 2 : index
    %323 = memref.load %arg3[%c4_138, %c2_139] : memref<6x4xf32, #tpu.memory_space<smem>>
    %324 = vector.broadcast %323 : f32 to vector<1x128xf32>
    %325 = arith.mulf %203, %324 : vector<1x128xf32>
    %326 = arith.addf %322, %325 : vector<1x128xf32>
    %c5_140 = arith.constant 5 : index
    %c2_141 = arith.constant 2 : index
    %327 = memref.load %arg3[%c5_140, %c2_141] : memref<6x4xf32, #tpu.memory_space<smem>>
    %328 = vector.broadcast %327 : f32 to vector<1x128xf32>
    %329 = arith.mulf %242, %328 : vector<1x128xf32>
    %330 = arith.addf %326, %329 : vector<1x128xf32>
    %331 = arith.negf %330 : vector<1x128xf32>
    %332 = math.exp %331 : vector<1x128xf32>
    %cst_142 = arith.constant 1.000000e+00 : f32
    %333 = vector.broadcast %cst_142 : f32 to vector<1x128xf32>
    %334 = arith.addf %333, %332 : vector<1x128xf32>
    %335 = arith.divf %333, %334 : vector<1x128xf32>
    %c0_143 = arith.constant 0 : index
    %c3_144 = arith.constant 3 : index
    %336 = memref.load %arg3[%c0_143, %c3_144] : memref<6x4xf32, #tpu.memory_space<smem>>
    %337 = vector.broadcast %336 : f32 to vector<1x128xf32>
    %338 = arith.mulf %47, %337 : vector<1x128xf32>
    %c3_145 = arith.constant 3 : index
    %339 = memref.load %arg4[%c3_145] : memref<4xf32, #tpu.memory_space<smem>>
    %340 = vector.broadcast %339 : f32 to vector<1x128xf32>
    %341 = arith.addf %338, %340 : vector<1x128xf32>
    %c1_146 = arith.constant 1 : index
    %c3_147 = arith.constant 3 : index
    %342 = memref.load %arg3[%c1_146, %c3_147] : memref<6x4xf32, #tpu.memory_space<smem>>
    %343 = vector.broadcast %342 : f32 to vector<1x128xf32>
    %344 = arith.mulf %86, %343 : vector<1x128xf32>
    %345 = arith.addf %341, %344 : vector<1x128xf32>
    %c2_148 = arith.constant 2 : index
    %c3_149 = arith.constant 3 : index
    %346 = memref.load %arg3[%c2_148, %c3_149] : memref<6x4xf32, #tpu.memory_space<smem>>
    %347 = vector.broadcast %346 : f32 to vector<1x128xf32>
    %348 = arith.mulf %125, %347 : vector<1x128xf32>
    %349 = arith.addf %345, %348 : vector<1x128xf32>
    %c3_150 = arith.constant 3 : index
    %c3_151 = arith.constant 3 : index
    %350 = memref.load %arg3[%c3_150, %c3_151] : memref<6x4xf32, #tpu.memory_space<smem>>
    %351 = vector.broadcast %350 : f32 to vector<1x128xf32>
    %352 = arith.mulf %164, %351 : vector<1x128xf32>
    %353 = arith.addf %349, %352 : vector<1x128xf32>
    %c4_152 = arith.constant 4 : index
    %c3_153 = arith.constant 3 : index
    %354 = memref.load %arg3[%c4_152, %c3_153] : memref<6x4xf32, #tpu.memory_space<smem>>
    %355 = vector.broadcast %354 : f32 to vector<1x128xf32>
    %356 = arith.mulf %203, %355 : vector<1x128xf32>
    %357 = arith.addf %353, %356 : vector<1x128xf32>
    %c5_154 = arith.constant 5 : index
    %c3_155 = arith.constant 3 : index
    %358 = memref.load %arg3[%c5_154, %c3_155] : memref<6x4xf32, #tpu.memory_space<smem>>
    %359 = vector.broadcast %358 : f32 to vector<1x128xf32>
    %360 = arith.mulf %242, %359 : vector<1x128xf32>
    %361 = arith.addf %357, %360 : vector<1x128xf32>
    %362 = arith.negf %361 : vector<1x128xf32>
    %363 = math.exp %362 : vector<1x128xf32>
    %cst_156 = arith.constant 1.000000e+00 : f32
    %364 = vector.broadcast %cst_156 : f32 to vector<1x128xf32>
    %365 = arith.addf %364, %363 : vector<1x128xf32>
    %366 = arith.divf %364, %365 : vector<1x128xf32>
    %c0_157 = arith.constant 0 : index
    %c0_158 = arith.constant 0 : index
    %367 = memref.load %arg5[%c0_157, %c0_158] : memref<4x1xf32, #tpu.memory_space<smem>>
    %368 = vector.broadcast %367 : f32 to vector<1x128xf32>
    %369 = arith.mulf %273, %368 : vector<1x128xf32>
    %c0_159 = arith.constant 0 : index
    %370 = memref.load %arg6[%c0_159] : memref<1xf32, #tpu.memory_space<smem>>
    %371 = vector.broadcast %370 : f32 to vector<1x128xf32>
    %372 = arith.addf %369, %371 : vector<1x128xf32>
    %c1_160 = arith.constant 1 : index
    %c0_161 = arith.constant 0 : index
    %373 = memref.load %arg5[%c1_160, %c0_161] : memref<4x1xf32, #tpu.memory_space<smem>>
    %374 = vector.broadcast %373 : f32 to vector<1x128xf32>
    %375 = arith.mulf %304, %374 : vector<1x128xf32>
    %376 = arith.addf %372, %375 : vector<1x128xf32>
    %c2_162 = arith.constant 2 : index
    %c0_163 = arith.constant 0 : index
    %377 = memref.load %arg5[%c2_162, %c0_163] : memref<4x1xf32, #tpu.memory_space<smem>>
    %378 = vector.broadcast %377 : f32 to vector<1x128xf32>
    %379 = arith.mulf %335, %378 : vector<1x128xf32>
    %380 = arith.addf %376, %379 : vector<1x128xf32>
    %c3_164 = arith.constant 3 : index
    %c0_165 = arith.constant 0 : index
    %381 = memref.load %arg5[%c3_164, %c0_165] : memref<4x1xf32, #tpu.memory_space<smem>>
    %382 = vector.broadcast %381 : f32 to vector<1x128xf32>
    %383 = arith.mulf %366, %382 : vector<1x128xf32>
    %384 = arith.addf %380, %383 : vector<1x128xf32>
    %385 = arith.negf %384 : vector<1x128xf32>
    %386 = math.exp %385 : vector<1x128xf32>
    %cst_166 = arith.constant 1.000000e+00 : f32
    %387 = vector.broadcast %cst_166 : f32 to vector<1x128xf32>
    %388 = arith.addf %387, %386 : vector<1x128xf32>
    %389 = arith.divf %387, %388 : vector<1x128xf32>
    %c0_167 = arith.constant 0 : index
    %c0_168 = arith.constant 0 : index
    %390 = vector.load %arg8[%c0_167, %c0_168] : memref<1x128xf32, #tpu.memory_space<vmem>>, vector<1x128xf32>
    tpu.vector_store %arg8[%c0_167, %c0_168], %389 {strides = array<i32>} : memref<1x128xf32, #tpu.memory_space<vmem>>, vector<1x128xf32>,
    return
  }
  func.func @transform_0(%arg0: i32) -> (i32, i32) {
    %c0_i32 = arith.constant 0 : i32
    %c0_i32_0 = arith.constant 0 : i32
    %c0_i32_1 = arith.constant 0 : i32
    return %c0_i32, %c0_i32_0 : i32, i32
  }
  func.func @transform_1(%arg0: i32) -> i32 {
    %c0_i32 = arith.constant 0 : i32
    %c0_i32_0 = arith.constant 0 : i32
    return %c0_i32 : i32
  }
  func.func @transform_2(%arg0: i32) -> (i32, i32) {
    %c0_i32 = arith.constant 0 : i32
    %c0_i32_0 = arith.constant 0 : i32
    %c0_i32_1 = arith.constant 0 : i32
    return %c0_i32, %c0_i32_0 : i32, i32
  }
  func.func @transform_3(%arg0: i32) -> i32 {
    %c0_i32 = arith.constant 0 : i32
    %c0_i32_0 = arith.constant 0 : i32
    return %c0_i32 : i32
  }
  func.func @transform_4(%arg0: i32) -> (i32, i32) {
    %c0_i32 = arith.constant 0 : i32
    %c0_i32_0 = arith.constant 0 : i32
    %c0_i32_1 = arith.constant 0 : i32
    return %c0_i32, %c0_i32_0 : i32, i32
  }
  func.func @transform_5(%arg0: i32) -> i32 {
    %c0_i32 = arith.constant 0 : i32
    %c0_i32_0 = arith.constant 0 : i32
    return %c0_i32 : i32
  }
  func.func @transform_6(%arg0: i32) -> (i32, i32) {
    %c0_i32 = arith.constant 0 : i32
    %c0_i32_0 = arith.constant 0 : i32
    return %c0_i32, %arg0 : i32, i32
  }
  func.func @transform_7(%arg0: i32) -> (i32, i32) {
    %c0_i32 = arith.constant 0 : i32
    %c0_i32_0 = arith.constant 0 : i32
    return %c0_i32, %arg0 : i32, i32
  }
}

</mosaic_0001>

<bundles_post_ra>
// kernel: mlp_forward.1
= control target key start
LH: loop header
LB: loop body
LE: loop exit
PB: predicated region body
PF: predicated region fallthrough
CT: control target
= control target key end

     0   :  { %13 = vsyncpa [#allocation4], 0  ;;  %s1119_s0 = inlined_call_operand.vmem [shape: f32[8,6], index: 0, kind: input, shape index: {}]   ;;  %s1120_s1 = inlined_call_operand.vmem [shape: f32[6], index: 1, kind: input, shape index: {}]   ;;  %s1121_s2 = inlined_call_operand.vmem [shape: f32[6,4], index: 2, kind: input, shape index: {}]   ;;  %s1122_s3 = inlined_call_operand.vmem [shape: f32[4], index: 3, kind: input, shape index: {}]   ;;  %s1123_s4 = inlined_call_operand.vmem [shape: f32[4,1], index: 4, kind: input, shape index: {}]   ;;  %s1124_s5 = inlined_call_operand.<no memory space> [shape: f32[1], index: 5, kind: input, shape index: {}]   ;;  %s1125_s6 = inlined_call_operand.vmem [shape: f32[8,128], index: 6, kind: input, shape index: {}]   ;;  %s1126_s7 = inlined_call_operand.vmem [shape: f32[1,128], index: 7, kind: output, shape index: {}]  }
   0x1   :  { %14 = vsyncpa [#allocation6], 0  ;;  %s32_s26 = sshll.u32 %s1120_s1, 4  ;;  %s33_s26 = int_to_ptr.vmem [resolvable:$true] %s32_s26 }
   0x2   :  { %15 = vsyncpa [#allocation9], 0  ;;  %s52_s29 = sshll.u32 %s1122_s3, 4  ;;  %s754_s30 = scalar_lea.vmem %s33_s26, 16  ;;  %s53_s29 = int_to_ptr.vmem [resolvable:$true] %s52_s29 }
   0x3   :  { %p755_p0 = scmp.ne.s32.totalorder %s33_s26, %s754_s30  ;;  %p759_p1 = scmp.lt.s32.totalorder %s33_s26, %s33_s26 }
   0x4   :  { %p760_p2 = scmp.lt.s32.totalorder %s754_s30, %s754_s30 }
   0x6   :  { %p761_p3 = por %p760_p2, %p759_p1 }
   0x8   :  { %p762_p4 = pnand %p761_p3, %p755_p0 }
   0xa   :  { %765 = shalt.err (!%p762_p4)
}
   0xb   :  { %s820_s8 = smov [#allocation5]   ;;  %s766_s9 = scalar_lea.vmem %s53_s29, 16 }
   0xc   :  { %35 = dma.vmem_to_smem %s33_s26, 16, %s820_s8, [#allocation6]  }
   0xd   :  { %p767_p5 = scmp.ne.s32.totalorder %s53_s29, %s766_s9  ;;  %p771_p6 = scmp.lt.s32.totalorder %s53_s29, %s53_s29 }
   0xe   :  { %p772_p7 = scmp.lt.s32.totalorder %s766_s9, %s766_s9 }
  0x10   :  { %p773_p8 = por %p772_p7, %p771_p6 }
  0x12   :  { %p774_p9 = pnand %p773_p8, %p767_p5 }
  0x14   :  { %777 = shalt.err (!%p774_p9)
}
  0x15   :  { %s821_s1 = smov [#allocation8]   ;;  %s22_s11 = sshll.u32 %s1119_s0, 4  ;;  %s23_s11 = int_to_ptr.vmem [resolvable:$true] %s22_s11 }
  0x16   :  { %55 = dma.vmem_to_smem %s53_s29, 16, %s821_s1, [#allocation9]  }
  0x17   :  { %s42_s14 = sshll.u32 %s1121_s2, 4  ;;  %s778_s15 = scalar_lea.vmem %s23_s11, 128  ;;  %s43_s14 = int_to_ptr.vmem [resolvable:$true] %s42_s14 }
  0x18   :  { %p779_p10 = scmp.ne.s32.totalorder %s23_s11, %s778_s15  ;;  %p783_p11 = scmp.lt.s32.totalorder %s23_s11, %s23_s11 }
  0x19   :  { %p784_p12 = scmp.lt.s32.totalorder %s778_s15, %s778_s15 }
  0x1b   :  { %p785_p13 = por %p784_p12, %p783_p11 }
  0x1d   :  { %p786_p0 = pnand %p785_p13, %p779_p10 }
  0x1f   :  { %789 = shalt.err (!%p786_p0)
}
  0x20   :  { %s822_s16 = smov [#allocation3]   ;;  %s790_s17 = scalar_lea.vmem %s43_s14, 128 }
  0x21   :  { %25 = dma.vmem_to_smem %s23_s11, 128, %s822_s16, [#allocation4]  }
  0x22   :  { %p791_p1 = scmp.ne.s32.totalorder %s43_s14, %s790_s17  ;;  %p795_p2 = scmp.lt.s32.totalorder %s43_s14, %s43_s14 }
  0x23   :  { %p796_p3 = scmp.lt.s32.totalorder %s790_s17, %s790_s17 }
  0x25   :  { %p797_p4 = por %p796_p3, %p795_p2 }
  0x27   :  { %p798_p5 = pnand %p797_p4, %p791_p1 }
  0x29   :  { %801 = shalt.err (!%p798_p5)
}
  0x2a   :  { %s823_s0 = smov [#allocation7]   ;;  %s62_s19 = sshll.u32 %s1123_s4, 4  ;;  %s63_s19 = int_to_ptr.vmem [resolvable:$true] %s62_s19 }
  0x2b   :  { %45 = dma.vmem_to_smem %s43_s14, 128, %s823_s0, [#allocation6]  }
  0x2c   :  { %s802_s20 = scalar_lea.vmem %s63_s19, 64  ;;  %p807_p7 = scmp.lt.s32.totalorder %s63_s19, %s63_s19 }
  0x2d   :  { %p803_p6 = scmp.ne.s32.totalorder %s63_s19, %s802_s20  ;;  %p808_p8 = scmp.lt.s32.totalorder %s802_s20, %s802_s20 }
  0x2f   :  { %p809_p9 = por %p808_p8, %p807_p7 }
  0x31   :  { %p810_p10 = pnand %p809_p9, %p803_p6 }
  0x33   :  { %813 = shalt.err (!%p810_p10)
}
  0x34   :  { %s824_s21 = smov [#allocation10]  }
  0x35   :  { %65 = dma.vmem_to_smem %s63_s19, 64, %s824_s21, [#allocation9]  }
  0x36   :  { %814 = dma.done.wait [#allocation4], 128  }
  0x37   :  { %815 = vsyncadd [#allocation4], 4294967168 }
  0x38   :  { %816 = dma.done.wait [#allocation6], 144  }
  0x39   :  { %817 = vsyncadd [#allocation6], 4294967152 }
  0x3a   :  { %818 = dma.done.wait [#allocation9], 80  }
  0x3b   :  { %819 = vsyncadd [#allocation9], 4294967216 }
  0x3c   :  { %85 = sfence }
  0x3d   :  { %s87_s22 = sld [smem:[#allocation3]]  ;;  %v883_v0 = vld [vmem:[%s1125_s6] sm:$0xff] }
  0x3e   :  { %s90_s23 = sld [smem:[#allocation5]] }
  0x3f   :  { %s613_s4 = sld [smem:[#allocation3 + $0x80]] }
  0x40   :  { %s614_s24 = sld [smem:[#allocation3 + $0x100]] }
  0x41   :  { %s615_s27 = sld [smem:[#allocation3 + $0x180]] }
  0x42   :  { %s616_s28 = sld [smem:[#allocation3 + $0x200]] }
  0x43   :  { %v88_v1 = vstv %s87_s22  ;;  %s617_s29 = sld [smem:[#allocation3 + $0x280]] }
  0x44   :  { %v89_v2 = vmul.f32 %v88_v1, %v883_v0  ;;  %v91_v3 = vstv %s90_s23  ;;  %s618_s30 = sld [smem:[#allocation3 + $0x300]] }
  0x45   :  { %v94_v4 = vstv %s613_s4  ;;  %s886_s8 = sld [smem:[#allocation3 + $0x380]] }
  0x46   :  { %v92_v5 = vadd.f32 %v91_v3, %v89_v2  ;;  %v95_v6 = vmul.f32 %v94_v4, %v883_v0  ;;  %v101_v7 = vstv %s614_s24  ;;  %s621_s9 = sld [smem:[#allocation3 + $0x1]] }
  0x47   :  { %v102_v8 = vmul.f32 %v101_v7, %v883_v0  ;;  %v108_v9 = vstv %s615_s27  ;;  %s622_s6 = sld [smem:[#allocation5 + $0x1]] }
  0x48   :  { %v97_v10 = vrot.slane %v95_v6, 1  ;;  %v109_v11 = vmul.f32 %v108_v9, %v883_v0  ;;  %v115_v12 = vstv %s616_s28  ;;  %s623_s1 = sld [smem:[#allocation3 + $0x81]] }
  0x49   :  { %v104_v13 = vrot.slane %v102_v8, 2  ;;  %v116_v14 = vmul.f32 %v115_v12, %v883_v0  ;;  %v122_v15 = vstv %s617_s29  ;;  %s624_s3 = sld [smem:[#allocation3 + $0x101]] }
  0x4a   :  { %v99_v16 = vadd.f32 %v97_v10, %v92_v5  ;;  %v111_v17 = vrot.slane %v109_v11, 3  ;;  %v123_v18 = vmul.f32 %v122_v15, %v883_v0  ;;  %v129_v19 = vstv %s618_s30  ;;  %s625_s10 = sld [smem:[#allocation3 + $0x181]] }
  0x4b   :  { %s626_s11 = sld [smem:[#allocation3 + $0x201]]  ;;  %v118_v21 = vrot.slane %v116_v14, 4  ;;  %v130_v23 = vmul.f32 %v129_v19, %v883_v0  ;;  %v136_v24 = vstv %s886_s8 }
  0x4c   :  { %v106_v20 = vadd.f32 %v104_v13, %v99_v16  ;;  %v149_v22 = vstv %s621_s9  ;;  %s893_s12 = sld [smem:[#allocation3 + $0x281]]  ;;  %v125_v28 = vrot.slane %v123_v18, 5  ;;  %v137_v34 = vmul.f32 %v136_v24, %v883_v0 }
  0x4d   :  { %v150_v25 = vmul.f32 %v149_v22, %v883_v0  ;;  %v152_v26 = vstv %s622_s6  ;;  %s898_s13 = sld [smem:[#allocation3 + $0x301]]  ;;  %v132_v37 = vrot.slane %v130_v23, 6 }
  0x4e   :  { %v113_v27 = vadd.f32 %v111_v17, %v106_v20  ;;  %v155_v29 = vstv %s623_s1  ;;  %s900_s14 = sld [smem:[#allocation3 + $0x381]]  ;;  %v139_v55 = vrot.slane %v137_v34, 7 }
  0x4f   :  { %v153_v30 = vadd.f32 %v152_v26, %v150_v25  ;;  %v156_v31 = vmul.f32 %v155_v29, %v883_v0  ;;  %v162_v32 = vstv %s624_s3  ;;  %s631_s15 = sld [smem:[#allocation3 + $0x2]] }
  0x50   :  { %v120_v33 = vadd.f32 %v118_v21, %v113_v27  ;;  %v163_v35 = vmul.f32 %v162_v32, %v883_v0  ;;  %v169_v36 = vstv %s625_s10  ;;  %s905_s16 = sld [smem:[#allocation5 + $0x2]] }
  0x51   :  { %v158_v38 = vrot.slane %v156_v31, 1  ;;  %v170_v39 = vmul.f32 %v169_v36, %v883_v0  ;;  %v176_v40 = vstv %s626_s11  ;;  %s633_s17 = sld [smem:[#allocation3 + $0x82]] }
  0x52   :  { %v127_v41 = vadd.f32 %v125_v28, %v120_v33  ;;  %v165_v42 = vrot.slane %v163_v35, 2  ;;  %v177_v43 = vmul.f32 %v176_v40, %v883_v0  ;;  %v183_v44 = vstv %s893_s12  ;;  %s634_s0 = sld [smem:[#allocation3 + $0x102]] }
  0x53   :  { %v160_v45 = vadd.f32 %v158_v38, %v153_v30  ;;  %v172_v46 = vrot.slane %v170_v39, 3  ;;  %v184_v47 = vmul.f32 %v183_v44, %v883_v0  ;;  %v190_v48 = vstv %s898_s13  ;;  %s635_s2 = sld [smem:[#allocation3 + $0x182]] }
  0x54   :  { %v179_v49 = vrot.slane %v177_v43, 4  ;;  %s912_s18 = sld [smem:[#allocation3 + $0x202]]  ;;  %v191_v51 = vmul.f32 %v190_v48, %v883_v0  ;;  %v197_v52 = vstv %s900_s14  ;;  %v134_v54 = vadd.f32 %v132_v37, %v127_v41 }
  0x55   :  { %v167_v50 = vadd.f32 %v165_v42, %v160_v45  ;;  %v210_v53 = vstv %s631_s15  ;;  %s916_s19 = sld [smem:[#allocation3 + $0x282]]  ;;  %v186_v59 = vrot.slane %v184_v47, 5  ;;  %v198_v61 = vmul.f32 %v197_v52, %v883_v0 }
  0x56   :  { %v211_v56 = vmul.f32 %v210_v53, %v883_v0  ;;  %v213_v57 = vstv %s905_s16  ;;  %s920_s20 = sld [smem:[#allocation3 + $0x302]]  ;;  %v193_v3 = vrot.slane %v191_v51, 6  ;;  %v141_v6 = vadd.f32 %v139_v55, %v134_v54 }
  0x57   :  { %v174_v58 = vadd.f32 %v172_v46, %v167_v50  ;;  %v216_v60 = vstv %s633_s17  ;;  %s922_s21 = sld [smem:[#allocation3 + $0x382]]  ;;  %v200_v19 = vrot.slane %v198_v61, 7 }
  0x58   :  { %v214_v62 = vadd.f32 %v213_v57, %v211_v56  ;;  %v217_v63 = vmul.f32 %v216_v60, %v883_v0  ;;  %v223_v1 = vstv %s634_s0  ;;  %s926_s22 = sld [smem:[#allocation3 + $0x3]]  ;;  %v620_v28 = vmul.f32 -1.442695, %v141_v6 }
  0x59   :  { %v181_v2 = vadd.f32 %v179_v49, %v174_v58  ;;  %v224_v4 = vmul.f32 %v223_v1, %v883_v0  ;;  %v230_v5 = vstv %s635_s2  ;;  %s929_s23 = sld [smem:[#allocation5 + $0x3]] }
  0x5a   :  { %v219_v7 = vrot.slane %v217_v63, 1  ;;  %v231_v8 = vmul.f32 %v230_v5, %v883_v0  ;;  %v237_v9 = vstv %s912_s18  ;;  %s933_s4 = sld [smem:[#allocation3 + $0x83]]  ;;  %710 = vpow2.f32 %v620_v28 }
  0x5b   :  { %v188_v10 = vadd.f32 %v186_v59, %v181_v2  ;;  %v226_v11 = vrot.slane %v224_v4, 2  ;;  %v238_v12 = vmul.f32 %v237_v9, %v883_v0  ;;  %v244_v13 = vstv %s916_s19  ;;  %s937_s24 = sld [smem:[#allocation3 + $0x103]] }
  0x5c   :  { %v221_v14 = vadd.f32 %v219_v7, %v214_v62  ;;  %v233_v15 = vrot.slane %v231_v8, 3  ;;  %v245_v16 = vmul.f32 %v244_v13, %v883_v0  ;;  %v251_v17 = vstv %s920_s20  ;;  %s941_s25 = sld [smem:[#allocation3 + $0x183]] }
  0x5d   :  { %v195_v18 = vadd.f32 %v193_v3, %v188_v10  ;;  %v258_v20 = vstv %s922_s21  ;;  %s944_s26 = sld [smem:[#allocation3 + $0x203]]  ;;  %v240_v22 = vrot.slane %v238_v12, 4  ;;  %v252_v23 = vmul.f32 %v251_v17, %v883_v0 }
  0x5e   :  { %v228_v21 = vadd.f32 %v226_v11, %v221_v14  ;;  %v271_v24 = vstv %s926_s22  ;;  %s948_s27 = sld [smem:[#allocation3 + $0x283]]  ;;  %v259_v25 = vmul.f32 %v258_v20, %v883_v0  ;;  %v247_v30 = vrot.slane %v245_v16, 5 }
  0x5f   :  { %v272_v26 = vmul.f32 %v271_v24, %v883_v0  ;;  %v274_v27 = vstv %s929_s23  ;;  %s953_s28 = sld [smem:[#allocation3 + $0x303]]  ;;  %v202_v32 = vadd.f32 %v200_v19, %v195_v18  ;;  %v254_v37 = vrot.slane %v252_v23, 6 }
  0x60   :  { %v235_v29 = vadd.f32 %v233_v15, %v228_v21  ;;  %v277_v31 = vstv %s933_s4  ;;  %s956_s29 = sld [smem:[#allocation3 + $0x383]]  ;;  %v261_v40 = vrot.slane %v259_v25, 7 }
  0x61   :  { %v275_v33 = vadd.f32 %v274_v27, %v272_v26  ;;  %v278_v34 = vmul.f32 %v277_v31, %v883_v0  ;;  %v284_v35 = vstv %s937_s24  ;;  %s960_s30 = sld [smem:[#allocation3 + $0x4]]  ;;  %v630_v52 = vmul.f32 -1.442695, %v202_v32 }
  0x62   :  { %v242_v36 = vadd.f32 %v240_v22, %v235_v29  ;;  %v285_v38 = vmul.f32 %v284_v35, %v883_v0  ;;  %v291_v39 = vstv %s941_s25  ;;  %s964_s8 = sld [smem:[#allocation5 + $0x4]] }
  0x63   :  { %v280_v41 = vrot.slane %v278_v34, 1  ;;  %v292_v42 = vmul.f32 %v291_v39, %v883_v0  ;;  %v298_v43 = vstv %s944_s26  ;;  %s968_s9 = sld [smem:[#allocation3 + $0x84]]  ;;  %712 = vpow2.f32 %v630_v52 }
  0x64   :  { %v249_v44 = vadd.f32 %v247_v30, %v242_v36  ;;  %v287_v45 = vrot.slane %v285_v38, 2  ;;  %v299_v46 = vmul.f32 %v298_v43, %v883_v0  ;;  %v305_v47 = vstv %s948_s27  ;;  %s972_s6 = sld [smem:[#allocation3 + $0x104]] }
  0x65   :  { %v282_v48 = vadd.f32 %v280_v41, %v275_v33  ;;  %v294_v49 = vrot.slane %v292_v42, 3  ;;  %v306_v50 = vmul.f32 %v305_v47, %v883_v0  ;;  %v312_v51 = vstv %s953_s28  ;;  %s976_s1 = sld [smem:[#allocation3 + $0x184]] }
  0x66   :  { %v256_v53 = vadd.f32 %v254_v37, %v249_v44  ;;  %v319_v54 = vstv %s956_s29  ;;  %s979_s3 = sld [smem:[#allocation3 + $0x204]]  ;;  %v301_v56 = vrot.slane %v299_v46, 4  ;;  %v313_v57 = vmul.f32 %v312_v51, %v883_v0 }
  0x67   :  { %v289_v55 = vadd.f32 %v287_v45, %v282_v48  ;;  %v332_v58 = vstv %s960_s30  ;;  %s983_s10 = sld [smem:[#allocation3 + $0x284]]  ;;  %v308_v59 = vrot.slane %v306_v50, 5  ;;  %v320_v60 = vmul.f32 %v319_v54, %v883_v0  ;;  %v711_v43 = vpop.eup %710 }
  0x68   :  { %v333_v61 = vmul.f32 %v332_v58, %v883_v0  ;;  %s987_s11 = sld [smem:[#allocation3 + $0x304]]  ;;  %v263_v62 = vadd.f32 %v261_v40, %v256_v53  ;;  %v335_v1 = vstv %s964_s8  ;;  %v315_v6 = vrot.slane %v313_v57, 6 }
  0x69   :  { %v296_v63 = vadd.f32 %v294_v49, %v289_v55  ;;  %v338_v2 = vstv %s968_s9  ;;  %s991_s12 = sld [smem:[#allocation3 + $0x384]]  ;;  %v322_v9 = vrot.slane %v320_v60, 7  ;;  %v145_v58 = vadd.f32 1.0, %v711_v43 }
  0x6a   :  { %v336_v3 = vadd.f32 %v335_v1, %v333_v61  ;;  %v339_v4 = vmul.f32 %v338_v2, %v883_v0  ;;  %s994_s13 = sld [smem:[#allocation3 + $0x5]]  ;;  %v345_v7 = vstv %s972_s6  ;;  %v640_v13 = vmul.f32 -1.442695, %v263_v62 }
  0x6b   :  { %v303_v5 = vadd.f32 %v301_v56, %v296_v63  ;;  %v352_v8 = vstv %s976_s1  ;;  %s998_s14 = sld [smem:[#allocation5 + $0x5]]  ;;  %v346_v11 = vmul.f32 %v345_v7, %v883_v0 }
  0x6c   :  { %v341_v10 = vrot.slane %v339_v4, 1  ;;  %v353_v12 = vmul.f32 %v352_v8, %v883_v0  ;;  %s1002_s15 = sld [smem:[#allocation3 + $0x85]]  ;;  %v359_v15 = vstv %s979_s3  ;;  %714 = vpow2.f32 %v640_v13 }
  0x6d   :  { %v310_v14 = vadd.f32 %v308_v59, %v303_v5  ;;  %v366_v16 = vstv %s983_s10  ;;  %s1006_s16 = sld [smem:[#allocation3 + $0x105]]  ;;  %v348_v18 = vrot.slane %v346_v11, 2  ;;  %v360_v20 = vmul.f32 %v359_v15, %v883_v0 }
  0x6e   :  { %v343_v17 = vadd.f32 %v341_v10, %v336_v3  ;;  %v355_v19 = vrot.slane %v353_v12, 3  ;;  %s1009_s17 = sld [smem:[#allocation3 + $0x185]]  ;;  %v367_v22 = vmul.f32 %v366_v16, %v883_v0  ;;  %v373_v23 = vstv %s987_s11 }
  0x6f   :  { %v317_v21 = vadd.f32 %v315_v6, %v310_v14  ;;  %v380_v24 = vstv %s991_s12  ;;  %s1014_s0 = sld [smem:[#allocation3 + $0x205]]  ;;  %v362_v26 = vrot.slane %v360_v20, 4  ;;  %v374_v27 = vmul.f32 %v373_v23, %v883_v0 }
  0x70   :  { %v350_v25 = vadd.f32 %v348_v18, %v343_v17  ;;  %v381_v28 = vmul.f32 %v380_v24, %v883_v0  ;;  %s1018_s2 = sld [smem:[#allocation3 + $0x285]]  ;;  %v393_v30 = vstv %s994_s13  ;;  %v369_v32 = vrot.slane %v367_v22, 5  ;;  %v713_v51 = vpop.eup %712 }
  0x71   :  { %v324_v29 = vadd.f32 %v322_v9, %v317_v21  ;;  %s1021_s18 = sld [smem:[#allocation3 + $0x305]]  ;;  %v376_v33 = vrot.slane %v374_v27, 6  ;;  %v394_v34 = vmul.f32 %v393_v30, %v883_v0  ;;  %v396_v37 = vstv %s998_s14 }
  0x72   :  { %v357_v31 = vadd.f32 %v355_v19, %v350_v25  ;;  %s1024_s19 = sld [smem:[#allocation3 + $0x385]]  ;;  %v383_v36 = vrot.slane %v381_v28, 7  ;;  %v399_v38 = vstv %s1002_s15  ;;  %v206_v6 = vadd.f32 1.0, %v713_v51 }
  0x73   :  { %v650_v35 = vmul.f32 -1.442695, %v324_v29  ;;  %v397_v40 = vadd.f32 %v396_v37, %v394_v34  ;;  %v400_v41 = vmul.f32 %v399_v38, %v883_v0  ;;  %v406_v42 = vstv %s1006_s16  ;;  %s1041_s20 = sld [smem:[#allocation7]] }
  0x74   :  { %v364_v39 = vadd.f32 %v362_v26, %v357_v31  ;;  %v407_v44 = vmul.f32 %v406_v42, %v883_v0  ;;  %v413_v45 = vstv %s1009_s17  ;;  %s1043_s21 = sld [smem:[#allocation8]] }
  0x75   :  { %716 = vpow2.f32 %v650_v35  ;;  %v420_v46 = vstv %s1014_s0  ;;  %v402_v48 = vrot.slane %v400_v41, 1  ;;  %v414_v49 = vmul.f32 %v413_v45, %v883_v0  ;;  %s1045_s22 = sld [smem:[#allocation7 + $0x80]] }
  0x76   :  { %v371_v47 = vadd.f32 %v369_v32, %v364_v39  ;;  %v421_v50 = vmul.f32 %v420_v46, %v883_v0  ;;  %v409_v52 = vrot.slane %v407_v44, 2  ;;  %v427_v53 = vstv %s1018_s2  ;;  %s1047_s23 = sld [smem:[#allocation7 + $0x100]] }
  0x77   :  { %v434_v54 = vstv %s1021_s18  ;;  %v404_v56 = vadd.f32 %v402_v48, %v397_v40  ;;  %v416_v57 = vrot.slane %v414_v49, 3  ;;  %v428_v59 = vmul.f32 %v427_v53, %v883_v0  ;;  %s677_s4 = sld [smem:[#allocation7 + $0x1]] }
  0x78   :  { %v378_v55 = vadd.f32 %v376_v33, %v371_v47  ;;  %v441_v60 = vstv %s1024_s19  ;;  %v423_v63 = vrot.slane %v421_v50, 4  ;;  %v435_v1 = vmul.f32 %v434_v54, %v883_v0  ;;  %s1049_s24 = sld [smem:[#allocation8 + $0x1]] }
  0x79   :  { %v411_v62 = vadd.f32 %v409_v52, %v404_v56  ;;  %v430_v4 = vrot.slane %v428_v59, 5  ;;  %v442_v5 = vmul.f32 %v441_v60, %v883_v0  ;;  %718 = vrcp.f32 %v145_v58  ;;  %v715_v7 = vpop.eup %714  ;;  %s1051_s25 = sld [smem:[#allocation7 + $0x2]] }
  0x7a   :  { %v385_v61 = vadd.f32 %v383_v36, %v378_v55  ;;  %v437_v9 = vrot.slane %v435_v1, 6  ;;  %v267_v12 = vadd.f32 1.0, %v715_v7  ;;  %s1053_s26 = sld [smem:[#allocation7 + $0x81]]  ;;  %v454_v18 = vstv %s1041_s20 }
  0x7b   :  { %v418_v3 = vadd.f32 %v416_v57, %v411_v62  ;;  %v444_v11 = vrot.slane %v442_v5, 7  ;;  %s1055_s27 = sld [smem:[#allocation7 + $0x101]]  ;;  %v457_v24 = vstv %s1043_s21  ;;  %v460_v25 = vstv %s1045_s22 }
  0x7c   :  { %v660_v2 = vmul.f32 -1.442695, %v385_v61  ;;  %s1057_s28 = sld [smem:[#allocation8 + $0x2]]  ;;  %v464_v42 = vstv %s1047_s23 }
  0x7d   :  { %v425_v8 = vadd.f32 %v423_v63, %v418_v3  ;;  %s1059_s29 = sld [smem:[#allocation7 + $0x82]]  ;;  %v486_v19 = vstv %s677_s4 }
  0x7e   :  { %720 = vpow2.f32 %v660_v2  ;;  %s693_s30 = sld [smem:[#allocation7 + $0x3]]  ;;  %v489_v28 = vstv %s1049_s24 }
  0x7f   :  { %v432_v10 = vadd.f32 %v430_v4, %v425_v8  ;;  %722 = vrcp.f32 %v206_v6  ;;  %s1061_s8 = sld [smem:[#allocation8 + $0x3]]  ;;  %v518_v21 = vstv %s1051_s25 }
  0x80   :  { %724 = vrcp.f32 %v267_v12  ;;  %s1064_s9 = sld [smem:[#allocation7 + $0x83]]  ;;  %v492_v29 = vstv %s1053_s26 }
  0x81   :  { %v439_v13 = vadd.f32 %v437_v9, %v432_v10  ;;  %s1067_s6 = sld [smem:[#allocation7 + $0x102]]  ;;  %v496_v45 = vstv %s1055_s27 }
  0x82   :  { %v717_v0 = vpop.eup %716  ;;  %s1069_s1 = sld [smem:[#allocation7 + $0x103]]  ;;  %v521_v32 = vstv %s1057_s28 }
  0x83   :  { %v446_v14 = vadd.f32 %v444_v11, %v439_v13  ;;  %v328_v15 = vadd.f32 1.0, %v717_v0  ;;  %s1073_s3 = sld [smem:[#allocation7 + $0x180]]  ;;  %v524_v33 = vstv %s1059_s29 }
  0x84   :  { %s1077_s10 = sld [smem:[#allocation7 + $0x181]]  ;;  %v550_v31 = vstv %s693_s30 }
  0x85   :  { %v670_v16 = vmul.f32 -1.442695, %v446_v14  ;;  %s1081_s11 = sld [smem:[#allocation7 + $0x182]]  ;;  %v553_v35 = vstv %s1061_s8 }
  0x86   :  { %v719_v17 = vpop.eup %718  ;;  %v556_v36 = vstv %s1064_s9  ;;  %s1085_s12 = sld [smem:[#allocation7 + $0x183]] }
  0x87   :  { %726 = vpow2.f32 %v670_v16  ;;  %v455_v23 = vmul.f32 %v719_v17, %v454_v18  ;;  %v487_v26 = vmul.f32 %v719_v17, %v486_v19  ;;  %v519_v30 = vmul.f32 %v719_v17, %v518_v21  ;;  %s1088_s13 = sld [smem:[#allocation7 + $0x200]] }
  0x88   :  { %728 = vrcp.f32 %v328_v15  ;;  %v551_v34 = vmul.f32 %v719_v17, %v550_v31  ;;  %s1091_s14 = sld [smem:[#allocation7 + $0x201]]  ;;  %v528_v46 = vstv %s1067_s6  ;;  %v560_v49 = vstv %s1069_s1 }
  0x89   :  { %v458_v37 = vadd.f32 %v457_v24, %v455_v23  ;;  %v490_v39 = vadd.f32 %v489_v28, %v487_v26  ;;  %v522_v43 = vadd.f32 %v521_v32, %v519_v30  ;;  %s1094_s15 = sld [smem:[#allocation7 + $0x202]]  ;;  %v468_v59 = vstv %s1073_s3 }
  0x8a   :  { %v554_v47 = vadd.f32 %v553_v35, %v551_v34  ;;  %s1097_s16 = sld [smem:[#allocation7 + $0x203]]  ;;  %v500_v62 = vstv %s1077_s10 }
  0x8b   :  { %v721_v20 = vpop.eup %720  ;;  %s1100_s17 = sld [smem:[#allocation7 + $0x280]]  ;;  %v532_v63 = vstv %s1081_s11 }
  0x8c   :  { %v389_v22 = vadd.f32 1.0, %v721_v20  ;;  %v723_v27 = vpop.eup %722  ;;  %v564_v1 = vstv %s1085_s12  ;;  %s1105_s0 = sld [smem:[#allocation7 + $0x281]] }
  0x8d   :  { %v461_v38 = vmul.f32 %v723_v27, %v460_v25  ;;  %v493_v40 = vmul.f32 %v723_v27, %v492_v29  ;;  %v725_v41 = vpop.eup %724  ;;  %v525_v44 = vmul.f32 %v723_v27, %v524_v33  ;;  %v557_v48 = vmul.f32 %v723_v27, %v556_v36  ;;  %s691_s2 = sld [smem:[#allocation7 + $0x282]] }
  0x8e   :  { %730 = vrcp.f32 %v389_v22  ;;  %v465_v52 = vmul.f32 %v725_v41, %v464_v42  ;;  %v497_v55 = vmul.f32 %v725_v41, %v496_v45  ;;  %v529_v57 = vmul.f32 %v725_v41, %v528_v46  ;;  %s699_s18 = sld [smem:[#allocation7 + $0x283]] }
  0x8f   :  { %v462_v51 = vadd.f32 %v461_v38, %v458_v37  ;;  %v494_v53 = vadd.f32 %v493_v40, %v490_v39  ;;  %v526_v56 = vadd.f32 %v525_v44, %v522_v43  ;;  %v558_v60 = vadd.f32 %v557_v48, %v554_v47  ;;  %s581_s19 = sld [smem:[#allocation10]] }
  0x90   :  { %v561_v61 = vmul.f32 %v725_v41, %v560_v49  ;;  %v472_v11 = vstv %s1088_s13  ;;  %v504_v12 = vstv %s1091_s14  ;;  %v536_v0 = vstv %s1094_s15  ;;  %s701_s20 = sld [smem:[#allocation10 + $0x80]] }
  0x91   :  { %v466_v2 = vadd.f32 %v465_v52, %v462_v51  ;;  %v498_v4 = vadd.f32 %v497_v55, %v494_v53  ;;  %v530_v5 = vadd.f32 %v529_v57, %v526_v56  ;;  %v568_v13 = vstv %s1097_s16  ;;  %s702_s21 = sld [smem:[#allocation10 + $0x100]] }
  0x92   :  { %v562_v8 = vadd.f32 %v561_v61, %v558_v60  ;;  %v476_v22 = vstv %s1100_s17  ;;  %v508_v23 = vstv %s1105_s0  ;;  %s703_s22 = sld [smem:[#allocation10 + $0x180]] }
  0x93   :  { %v540_v24 = vstv %s691_s2 }
  0x94   :  { %v727_v50 = vpop.eup %726  ;;  %v572_v25 = vstv %s699_s18 }
  0x95   :  { %v450_v54 = vadd.f32 1.0, %v727_v50  ;;  %v729_v58 = vpop.eup %728  ;;  %v582_v51 = vstv %s581_s19 }
  0x96   :  { %v469_v3 = vmul.f32 %v729_v58, %v468_v59  ;;  %v501_v6 = vmul.f32 %v729_v58, %v500_v62  ;;  %v533_v7 = vmul.f32 %v729_v58, %v532_v63  ;;  %v565_v9 = vmul.f32 %v729_v58, %v564_v1 }
  0x97   :  { %732 = vrcp.f32 %v450_v54  ;;  %v588_v52 = vstv %s701_s20  ;;  %v585_v54 = vstv %s1124_s5  ;;  %v592_v55 = vstv %s702_s21 }
  0x98   :  { %v470_v14 = vadd.f32 %v469_v3, %v466_v2  ;;  %v502_v15 = vadd.f32 %v501_v6, %v498_v4  ;;  %v534_v16 = vadd.f32 %v533_v7, %v530_v5  ;;  %v566_v17 = vadd.f32 %v565_v9, %v562_v8 }
  0x99   :  { %v596_v60 = vstv %s703_s22 }
  0x9b   :  { %v731_v10 = vpop.eup %730 }
  0x9c   :  { %v473_v18 = vmul.f32 %v731_v10, %v472_v11  ;;  %v505_v19 = vmul.f32 %v731_v10, %v504_v12  ;;  %v537_v20 = vmul.f32 %v731_v10, %v536_v0  ;;  %v569_v21 = vmul.f32 %v731_v10, %v568_v13 }
  0x9e   :  { %v474_v26 = vadd.f32 %v473_v18, %v470_v14  ;;  %v506_v27 = vadd.f32 %v505_v19, %v502_v15  ;;  %v538_v28 = vadd.f32 %v537_v20, %v534_v16  ;;  %v570_v29 = vadd.f32 %v569_v21, %v566_v17 }
  0xa4   :  { %v733_v30 = vpop.eup %732 }
  0xa5   :  { %v477_v31 = vmul.f32 %v733_v30, %v476_v22  ;;  %v509_v32 = vmul.f32 %v733_v30, %v508_v23  ;;  %v541_v33 = vmul.f32 %v733_v30, %v540_v24  ;;  %v573_v34 = vmul.f32 %v733_v30, %v572_v25 }
  0xa7   :  { %v478_v35 = vadd.f32 %v477_v31, %v474_v26  ;;  %v510_v36 = vadd.f32 %v509_v32, %v506_v27  ;;  %v542_v37 = vadd.f32 %v541_v33, %v538_v28  ;;  %v574_v38 = vadd.f32 %v573_v34, %v570_v29 }
  0xa9   :  { %v676_v39 = vmul.f32 -1.442695, %v478_v35  ;;  %v684_v40 = vmul.f32 -1.442695, %v510_v36  ;;  %v692_v41 = vmul.f32 -1.442695, %v542_v37 }
  0xaa   :  { %v700_v42 = vmul.f32 -1.442695, %v574_v38 }
  0xab   :  { %734 = vpow2.f32 %v676_v39 }
  0xac   :  { %736 = vpow2.f32 %v684_v40 }
  0xad   :  { %738 = vpow2.f32 %v692_v41 }
  0xae   :  { %740 = vpow2.f32 %v700_v42 }
  0xb8   :  { %v735_v43 = vpop.eup %734 }
  0xb9   :  { %v737_v44 = vpop.eup %736  ;;  %v482_v45 = vadd.f32 1.0, %v735_v43 }
  0xba   :  { %v739_v46 = vpop.eup %738  ;;  %v514_v47 = vadd.f32 1.0, %v737_v44 }
  0xbb   :  { %v741_v48 = vpop.eup %740  ;;  %742 = vrcp.f32 %v482_v45  ;;  %v546_v49 = vadd.f32 1.0, %v739_v46 }
  0xbc   :  { %744 = vrcp.f32 %v514_v47  ;;  %v578_v50 = vadd.f32 1.0, %v741_v48 }
  0xbd   :  { %746 = vrcp.f32 %v546_v49 }
  0xbe   :  { %748 = vrcp.f32 %v578_v50 }
  0xc8   :  { %v743_v53 = vpop.eup %742 }
  0xc9   :  { %v745_v56 = vpop.eup %744  ;;  %v583_v57 = vmul.f32 %v743_v53, %v582_v51 }
  0xca   :  { %v747_v58 = vpop.eup %746  ;;  %v589_v59 = vmul.f32 %v745_v56, %v588_v52 }
  0xcb   :  { %v749_v61 = vpop.eup %748  ;;  %v586_v62 = vadd.f32 %v585_v54, %v583_v57  ;;  %v593_v63 = vmul.f32 %v747_v58, %v592_v55 }
  0xcc   :  { %v597_v2 = vmul.f32 %v749_v61, %v596_v60 }
  0xcd   :  { %v590_v1 = vadd.f32 %v589_v59, %v586_v62 }
  0xcf   :  { %v594_v3 = vadd.f32 %v593_v63, %v590_v1 }
  0xd1   :  { %v598_v4 = vadd.f32 %v597_v2, %v594_v3 }
  0xd3   :  { %v704_v5 = vmul.f32 -1.442695, %v598_v4 }
  0xd5   :  { %750 = vpow2.f32 %v704_v5 }
  0xe2   :  { %v751_v6 = vpop.eup %750 }
  0xe3   :  { %v602_v7 = vadd.f32 1.0, %v751_v6 }
  0xe5   :  { %752 = vrcp.f32 %v602_v7 }
  0xf2   :  { %v753_v8 = vpop.eup %752 }
  0xf3   :  { %605 = vst [vmem:[%s1126_s7] sm:$0x1] %v753_v8 }
  0xf4   :  { %610 = vsyncpa [#allocation4], 1 }
  0xf5   :  { %611 = vsyncpa [#allocation6], 1 }
  0xf6   :  { %612 = vsyncpa [#allocation9], 1 }

</bundles_post_ra>
